<compile_context>
chip_gen: v6e
topology: v6e:2x2x1
jax: 0.10.0
libtpu: 0.0.40
codegen_flags: <defaults>
</compile_context>

<pallas_src>
import functools

import jax
import jax.numpy as jnp
from jax.experimental import pallas as pl
from jax.experimental.pallas import tpu as pltpu

LANE = 128     # TPU lane width; fused-head output dim is padded to this.
SUBLANE = 8


def _round_up(x, m):
    return (x + m - 1) // m * m


def encoder_att_kernel(x_ref, w1_ref, wh_ref, out_ref, *, slope, use_bf16_mxu):
    # fc1 (bias pre-folded into w1 via the ones column of x) + LeakyReLU.
    x = x_ref[...]
    w1 = w1_ref[...]
    if use_bf16_mxu:  # v6e/v7x MXU lever; keep elementwise math in f32 (v5e VPU has no bf16).
        x = x.astype(jnp.bfloat16)
        w1 = w1.astype(jnp.bfloat16)
    h = jnp.dot(x, w1, preferred_element_type=jnp.float32)
    # LeakyReLU(slope), slope in (0,1): max(h, slope*h). The bias-carry column
    # is exactly 1.0 pre-activation and stays 1.0, so the head bias row of
    # wh_aug is applied by the second matmul.
    h = jnp.maximum(h, slope * h)
    wh = wh_ref[...]
    if use_bf16_mxu:
        h = h.astype(jnp.bfloat16)
        wh = wh.astype(jnp.bfloat16)
    # Fused mu||logvar head: one MXU pass, one lane-dense (bm, 128) store.
    out_ref[...] = jnp.dot(h, wh, preferred_element_type=jnp.float32).astype(out_ref.dtype)


def prepare_encoder_att_params(w1, b1, wmu, bmu, wlv, blv):
    """Build fused/augmented weights ONCE (at parameter-init time).

    Returns:
      w1_aug : (att_aug, hid_aug) f32. Rows :att = fc1 weight (in,out layout);
               row `att` = fc1 bias (picked up by the ones column appended to
               the input); column `hid` is a bias-carry column producing a
               constant 1.0 hidden activation; all other padding is zero.
      wh_aug : (hid_aug, 128) f32. Rows :hid = [mu || logvar] head weights
               (zero-padded to 128 lanes); row `hid` = [bmu || blv] head biases
               (applied via the bias-carry column).
    """
    att, hid = w1.shape
    lat = wmu.shape[1]
    assert 2 * lat <= LANE, "fused head must fit in one 128-lane vreg row"
    att_aug = _round_up(att + 1, SUBLANE)   # +1 ones column (folds b1)
    hid_aug = _round_up(hid + 1, SUBLANE)   # +1 bias-carry column (folds head bias)

    w1_aug = jnp.zeros((att_aug, hid_aug), jnp.float32)
    w1_aug = w1_aug.at[:att, :hid].set(w1.astype(jnp.float32))
    w1_aug = w1_aug.at[att, :hid].set(b1.astype(jnp.float32))
    w1_aug = w1_aug.at[att, hid].set(1.0)   # -> h[:, hid] == 1.0 (bias carry)

    wh_aug = jnp.zeros((hid_aug, LANE), jnp.float32)
    wh_aug = wh_aug.at[:hid, :lat].set(wmu.astype(jnp.float32))
    wh_aug = wh_aug.at[:hid, lat:2 * lat].set(wlv.astype(jnp.float32))
    wh_aug = wh_aug.at[hid, :lat].set(bmu.astype(jnp.float32))
    wh_aug = wh_aug.at[hid, lat:2 * lat].set(blv.astype(jnp.float32))
    return w1_aug, wh_aug


def encoder_att(res, w1_aug, wh_aug, activate_index, *, latent,
                block_rows=512, use_bf16_mxu=False):
    """Forward pass. res: (B, attSize); w1_aug/wh_aug from prepare_encoder_att_params."""
    B, att = res.shape
    att_aug, hid_aug = w1_aug.shape
    n_pad = wh_aug.shape[1]

    # Append the ones column (b1 fold) + zero padding up to att_aug lanes.
    res_aug = jnp.concatenate(
        [res.astype(jnp.float32),
         jnp.ones((B, 1), jnp.float32),
         jnp.zeros((B, att_aug - att - 1), jnp.float32)],
        axis=1)

    # Batch grid axis: lets v7x shard rows across its 2 TensorCores and keeps
    # the per-block VMEM footprint well under the 32 MiB scoped default.
    bm = min(block_rows, B)
    grid = (pl.cdiv(B, bm),)

    flops = 2 * B * (att_aug * hid_aug + hid_aug * n_pad)
    bytes_accessed = 4 * (B * att_aug + att_aug * hid_aug + hid_aug * n_pad + B * n_pad)

    kernel = functools.partial(encoder_att_kernel,
                               slope=float(activate_index),
                               use_bf16_mxu=use_bf16_mxu)

    out = pl.pallas_call(
        kernel,
        out_shape=jax.ShapeDtypeStruct((B, n_pad), jnp.float32),
        grid=grid,
        in_specs=[
            pl.BlockSpec((bm, att_aug), lambda i: (i, 0)),        # activations: tiled over rows
            pl.BlockSpec((att_aug, hid_aug), lambda i: (0, 0)),   # weights: replicated
            pl.BlockSpec((hid_aug, n_pad), lambda i: (0, 0)),
        ],
        out_specs=pl.BlockSpec((bm, n_pad), lambda i: (i, 0)),
        compiler_params=pltpu.CompilerParams(dimension_semantics=("parallel",)),
        cost_estimate=pl.CostEstimate(flops=flops, transcendentals=0,
                                      bytes_accessed=bytes_accessed),
    )(res_aug, w1_aug, wh_aug)

    mu = out[:, :latent]
    logvar = out[:, latent:2 * latent]
    return mu, logvar


def init_linear(key, in_dim, out_dim):
    # weights_init: weight ~ N(0, 0.02), bias = 0. PyTorch weight shape is
    # (out, in); we store the transpose (in, out) directly (N(0,0.02) is symmetric).
    w = 0.02 * jax.random.normal(key, (in_dim, out_dim), dtype=jnp.float32)
    b = jnp.zeros((out_dim,), dtype=jnp.float32)
    return w, b


if __name__ == "__main__":
    # opt: attSize=32, netE_hid=64, latent_feature_size=16, activate_index=0.2
    attSize, netE_hid, latent, batch = 32, 64, 16, 8
    activate_index = 0.2

    key = jax.random.PRNGKey(0)
    k_res, k1, k2, k3, k4 = jax.random.split(key, 5)

    res = jax.random.normal(k_res, (batch, attSize), dtype=jnp.float32)
    w1, b1 = init_linear(k1, attSize, netE_hid)
    # fc2 exists in __init__ but is unused in forward; initialize for parity only.
    w2, b2 = init_linear(k2, netE_hid, latent)
    wmu, bmu = init_linear(k3, netE_hid, latent)
    wlv, blv = init_linear(k4, netE_hid, latent)

    # One-time parameter fusion (hoisted out of the per-call path).
    w1_aug, wh_aug = prepare_encoder_att_params(w1, b1, wmu, bmu, wlv, blv)

    fwd = jax.jit(functools.partial(encoder_att,
                                    activate_index=activate_index,
                                    latent=latent))
    mu, logvar = fwd(res, w1_aug, wh_aug)
    jax.block_until_ready((mu, logvar))

    # Pure-JAX reference check (f32 path, tight tolerance).
    h_ref = res @ w1 + b1
    h_ref = jnp.where(h_ref > 0, h_ref, activate_index * h_ref)
    mu_ref = h_ref @ wmu + bmu
    lv_ref = h_ref @ wlv + blv
    assert mu.shape == (batch, latent) and logvar.shape == (batch, latent)
    assert jnp.allclose(mu, mu_ref, atol=1e-5) and jnp.allclose(logvar, lv_ref, atol=1e-5)

    print("KERNEL_OK")
</pallas_src>

<mosaic_0001>
module attributes {stable_mosaic.version = 11 : i64} {
  func.func @encoder_att_kernel(%arg0: i32, %arg1: memref<8x40xf32, #tpu.memory_space<vmem>>, %arg2: memref<40x72xf32, #tpu.memory_space<vmem>>, %arg3: memref<72x128xf32, #tpu.memory_space<vmem>>, %arg4: memref<8x128xf32, #tpu.memory_space<vmem>>) attributes {dimension_semantics = [#tpu.dimension_semantics<parallel>], iteration_bounds = array<i64: 1>, scalar_prefetch = 0 : i64, scratch_operands = 0 : i64, tpu.core_type = #tpu.core_type<tc>, window_params = [{transform_indices = @transform_0, window_bounds = array<i64: 8, 40>}, {pipeline_mode = #tpu.pipeline_mode<synchronous>, transform_indices = @transform_1, window_bounds = array<i64: 40, 72>}, {pipeline_mode = #tpu.pipeline_mode<synchronous>, transform_indices = @transform_2, window_bounds = array<i64: 72, 128>}, {transform_indices = @transform_3, window_bounds = array<i64: 8, 128>}]} {
    %c0 = arith.constant 0 : index
    %c0_0 = arith.constant 0 : index
    %0 = vector.load %arg1[%c0, %c0_0] : memref<8x40xf32, #tpu.memory_space<vmem>>, vector<8x40xf32>
    %c0_1 = arith.constant 0 : index
    %c0_2 = arith.constant 0 : index
    %1 = vector.load %arg2[%c0_1, %c0_2] : memref<40x72xf32, #tpu.memory_space<vmem>>, vector<40x72xf32>
    %cst = arith.constant dense<0.000000e+00> : vector<8x72xf32>
    %2 = tpu.matmul %0, %1, %cst {dimension_numbers = #tpu.dot_dimension_numbers<[1], [0], [0], [1], [0, 0, 1, 1], [], []>} : vector<8x40xf32>, vector<40x72xf32>, vector<8x72xf32> -> vector<8x72xf32>
    %cst_3 = arith.constant 2.000000e-01 : f32
    %3 = vector.broadcast %cst_3 : f32 to vector<8x72xf32>
    %4 = arith.mulf %3, %2 : vector<8x72xf32>
    %5 = arith.maximumf %2, %4 : vector<8x72xf32>
    %c0_4 = arith.constant 0 : index
    %c0_5 = arith.constant 0 : index
    %6 = vector.load %arg3[%c0_4, %c0_5] : memref<72x128xf32, #tpu.memory_space<vmem>>, vector<72x128xf32>
    %cst_6 = arith.constant dense<0.000000e+00> : vector<8x128xf32>
    %7 = tpu.matmul %5, %6, %cst_6 {dimension_numbers = #tpu.dot_dimension_numbers<[1], [0], [0], [1], [0, 0, 1, 1], [], []>} : vector<8x72xf32>, vector<72x128xf32>, vector<8x128xf32> -> vector<8x128xf32>
    %c0_7 = arith.constant 0 : index
    %c0_8 = arith.constant 0 : index
    %8 = vector.load %arg4[%c0_7, %c0_8] : memref<8x128xf32, #tpu.memory_space<vmem>>, vector<8x128xf32>
    tpu.vector_store %arg4[%c0_7, %c0_8], %7 {strides = array<i32>} : memref<8x128xf32, #tpu.memory_space<vmem>>, vector<8x128xf32>,
    return
  }
  func.func @transform_0(%arg0: i32) -> (i32, i32) {
    %c0_i32 = arith.constant 0 : i32
    %c0_i32_0 = arith.constant 0 : i32
    return %arg0, %c0_i32 : i32, i32
  }
  func.func @transform_1(%arg0: i32) -> (i32, i32) {
    %c0_i32 = arith.constant 0 : i32
    %c0_i32_0 = arith.constant 0 : i32
    %c0_i32_1 = arith.constant 0 : i32
    return %c0_i32, %c0_i32_0 : i32, i32
  }
  func.func @transform_2(%arg0: i32) -> (i32, i32) {
    %c0_i32 = arith.constant 0 : i32
    %c0_i32_0 = arith.constant 0 : i32
    %c0_i32_1 = arith.constant 0 : i32
    return %c0_i32, %c0_i32_0 : i32, i32
  }
  func.func @transform_3(%arg0: i32) -> (i32, i32) {
    %c0_i32 = arith.constant 0 : i32
    %c0_i32_0 = arith.constant 0 : i32
    return %arg0, %c0_i32 : i32, i32
  }
}

</mosaic_0001>

<bundles_post_ra>
// kernel: encoder_att.1
= control target key start
LH: loop header
LB: loop body
LE: loop exit
PB: predicated region body
PF: predicated region fallthrough
CT: control target
= control target key end

     0   :  { %8 = vsyncpa [#allocation3], 0  ;;  %s354_s0 = inlined_call_operand.vmem [shape: f32[8,40], index: 0, kind: input, shape index: {}]   ;;  %s355_s1 = inlined_call_operand.hbm [shape: f32[40,72], index: 1, kind: input, shape index: {}]   ;;  %s356_s2 = inlined_call_operand.hbm [shape: f32[72,128], index: 2, kind: input, shape index: {}]   ;;  %s357_s3 = inlined_call_operand.vmem [shape: f32[8,128], index: 3, kind: output, shape index: {}]  }
   0x1   :  { %9 = vsyncpa [#allocation5], 0  ;;  %s316_s12 = smov [#allocation2]  }
   0x2   :  { %s17_s13 = sshll.u32 %s316_s12, 4  ;;  %s18_s13 = int_to_ptr.vmem [resolvable:$true] %s17_s13 }
   0x3   :  { %s280_s14 = scalar_lea.vmem %s18_s13, 640  ;;  %p285_p1 = scmp.lt.s32.totalorder %s18_s13, %s18_s13 }
   0x4   :  { %p281_p0 = scmp.ne.s32.totalorder %s18_s13, %s280_s14  ;;  %p286_p2 = scmp.lt.s32.totalorder %s280_s14, %s280_s14 }
   0x6   :  { %p287_p3 = por %p286_p2, %p285_p1 }
   0x8   :  { %p288_p4 = pnand %p287_p3, %p281_p0 }
   0xa   :  { %291 = shalt.err (!%p288_p4)
}
   0xb   :  { %s317_s15 = smov 128   ;;  %s318_s16 = smov 8  }
   0xc   :  { %23 = dma.hbm_to_vmem [thread:$0]  %s355_s1, 640, %s18_s13, [#allocation3], %s317_s15, %s317_s15, %s318_s16  }
   0xd   :  { %s319_s19 = smov [#allocation4]  }
   0xe   :  { %s29_s20 = sshll.u32 %s319_s19, 4  ;;  %s30_s20 = int_to_ptr.vmem [resolvable:$true] %s29_s20 }
   0xf   :  { %s300_s21 = scalar_lea.vmem %s30_s20, 1152  ;;  %p305_p6 = scmp.lt.s32.totalorder %s30_s20, %s30_s20 }
  0x10   :  { %p301_p5 = scmp.ne.s32.totalorder %s30_s20, %s300_s21  ;;  %p306_p7 = scmp.lt.s32.totalorder %s300_s21, %s300_s21 }
  0x12   :  { %p307_p8 = por %p306_p7, %p305_p6 }
  0x14   :  { %p308_p9 = pnand %p307_p8, %p301_p5 }
  0x16   :  { %311 = shalt.err (!%p308_p9)
}
  0x17   :  { %35 = dma.hbm_to_vmem [thread:$0]  %s356_s2, 1152, %s30_s20, [#allocation5], %s317_s15, %s317_s15, %s318_s16  }
  0x18   :  { %312 = dma.done.wait [#allocation3], 640  }
  0x19   :  { %313 = vsyncadd [#allocation3], 4294966656 }
  0x1a   :  { %314 = dma.done.wait [#allocation5], 1152  }
  0x1b   :  { %315 = vsyncadd [#allocation5], 4294966144  ;;  %v320_v0 = vmov 0.0   ;;  %vm321_vm0 = vmmov 0   ;;  %v47_v1 = vld [vmem:[#allocation2 + $0x20] sm:$0xff]  ;;  %v46_v2 = vld [vmem:[#allocation2 + $0x18] sm:$0xff] }
  0x1c   :  { %232 = vmatprep.subr.mxu0 %v320_v0  ;;  %242 = vmatprep.mubr.msk.f32.mxu0 %vm321_vm0, %v320_v0  ;;  %v45_v3 = vld [vmem:[#allocation2 + $0x10] sm:$0xff]  ;;  %v132_v4 = vld [vmem:[#allocation4 + $0x40] sm:$0xff]  ;;  %v131_v5 = vld [vmem:[#allocation4 + $0x38] sm:$0xff]  ;;  %vm48_vm1 = vcmask 326656   ;;  %vm133_vm2 = vcmask 588800  }
  0x1d   :  { %245 = vmatprep.subr.mxu1 %v320_v0  ;;  %263 = vmatprep.mubr.msk.f32.mxu1 %vm321_vm0, %v320_v0  ;;  %v44_v6 = vld [vmem:[#allocation2 + $0x8] sm:$0xff]  ;;  %v130_v7 = vld [vmem:[#allocation4 + $0x30] sm:$0xff]  ;;  %v43_v8 = vld [vmem:[#allocation2] sm:$0xff] }
  0x1e   :  { %233 = vmatpush3.msra.mxu0 %v47_v1  ;;  %246 = vmatpush3.msra.mxu1 %v132_v4  ;;  %v129_v9 = vld [vmem:[#allocation4 + $0x28] sm:$0xff]  ;;  %v42_v10 = vld [vmem:[%s354_s0] sm:$0xff]  ;;  %v128_v11 = vld [vmem:[#allocation4 + $0x20] sm:$0xff] }
  0x1f   :  { %234 = vmatprep.subr.mxu0 %v320_v0  ;;  %247 = vmatprep.subr.mxu1 %v320_v0  ;;  %v127_v12 = vld [vmem:[#allocation4 + $0x18] sm:$0xff]  ;;  %v126_v13 = vld [vmem:[#allocation4 + $0x10] sm:$0xff]  ;;  %v125_v14 = vld [vmem:[#allocation4 + $0x8] sm:$0xff] }
  0x20   :  { %235 = vmatpush3.msra.mxu0 %v46_v2  ;;  %248 = vmatpush3.msra.mxu1 %v131_v5  ;;  %v124_v15 = vld [vmem:[#allocation4] sm:$0xff] }
  0x21   :  { %236 = vmatprep.subr.mxu0 %v320_v0  ;;  %249 = vmatprep.subr.mxu1 %v320_v0 }
  0x22   :  { %237 = vmatpush3.msra.mxu0 %v45_v3  ;;  %250 = vmatpush3.msra.mxu1 %v130_v7 }
  0x23   :  { %238 = vmatprep.subr.mxu0 %v320_v0  ;;  %251 = vmatprep.subr.mxu1 %v320_v0 }
  0x24   :  { %239 = vmatpush3.msra.mxu0 %v44_v6  ;;  %252 = vmatpush3.msra.mxu1 %v129_v9 }
  0x25   :  { %240 = vmatprep.subr.mxu0 %v320_v0  ;;  %253 = vmatprep.subr.mxu1 %v320_v0 }
  0x26   :  { %241 = vmatpush3.msra.mxu0 %v43_v8  ;;  %254 = vmatpush3.msra.mxu1 %v128_v11 }
  0x27   :  { %243 = vmatmul.mubr.msk.f32.vlgmr.msra.gmra.mxu0 %vm48_vm1, %v42_v10  ;;  %255 = vmatprep.subr.mxu1 %v320_v0 }
  0x28   :  { %256 = vmatpush3.msra.mxu1 %v127_v12 }
  0x29   :  { %257 = vmatprep.subr.mxu1 %v320_v0 }
  0x2a   :  { %258 = vmatpush3.msra.mxu1 %v126_v13 }
  0x2b   :  { %259 = vmatprep.subr.mxu1 %v320_v0 }
  0x2c   :  { %260 = vmatpush3.msra.mxu1 %v125_v14 }
  0x2d   :  { %261 = vmatprep.subr.mxu1 %v320_v0 }
  0x2e   :  { %262 = vmatpush3.msra.mxu1 %v124_v15 }
  0xe7   :  { %v118_v16 = vpop.f32.mrf.mxu0 }
  0xe8   :  { %v122_v17 = vmul.f32 0.2, %v118_v16 }
  0xe9   :  { %v244_v18 = vpop.f32.mrf.mxu0 }
  0xea   :  { %v123_v19 = vmax.f32 %v118_v16, %v122_v17 }
  0xec   :  { %264 = vmatmul.mubr.msk.f32.vlgmr.msra.gmra.mxu1 %vm133_vm2, %v123_v19 }
 0x1ac   :  { %v203_v20 = vpop.f32.mrf.mxu1 }
 0x1ad   :  { %207 = vst [vmem:[%s357_s3] sm:$0xff] %v203_v20 }
 0x1ae   :  { %v265_v21 = vpop.f32.mrf.mxu1 }
 0x1af   :  { %212 = vsyncpa [#allocation3], 1 }
 0x1b0   :  { %213 = vsyncpa [#allocation5], 1 }

</bundles_post_ra>
